<compile_context>
chip_gen: v7x
topology: tpu7x:2x2x1
jax: 0.10.0
libtpu: 0.0.40
codegen_flags: <defaults>
</compile_context>

<pallas_src>
import math
import numpy as np

import jax
import jax.numpy as jnp
from jax.experimental import pallas as pl
from jax.experimental.pallas import tpu as pltpu


# ------------------------------------------------------------------ DCT setup
def get_freq_indices(method):
    assert method in ['top1', 'top2', 'top4', 'top8', 'top16', 'top32',
                      'bot1', 'bot2', 'bot4', 'bot8', 'bot16', 'bot32',
                      'low1', 'low2', 'low4', 'low8', 'low16', 'low32']
    num_freq = int(method[3:])
    if 'top' in method:
        all_x = [0, 0, 6, 0, 0, 1, 1, 4, 5, 1, 3, 0, 0, 0, 3, 2,
                 4, 6, 3, 5, 5, 2, 6, 5, 5, 3, 3, 4, 2, 2, 6, 1]
        all_y = [0, 1, 0, 5, 2, 0, 2, 0, 0, 6, 0, 4, 6, 3, 5, 2,
                 6, 3, 3, 3, 5, 1, 1, 2, 4, 2, 1, 1, 3, 0, 5, 3]
    elif 'low' in method:
        all_x = [0, 0, 1, 1, 0, 2, 2, 1, 2, 0, 3, 4, 0, 1, 3, 0,
                 1, 2, 3, 4, 5, 0, 1, 2, 3, 4, 5, 6, 1, 2, 3, 4]
        all_y = [0, 1, 0, 1, 2, 0, 1, 2, 2, 3, 0, 0, 4, 3, 1, 5,
                 4, 3, 2, 1, 0, 6, 5, 4, 3, 2, 1, 0, 6, 5, 4, 3]
    else:  # bot
        all_x = [6, 1, 3, 3, 2, 4, 1, 2, 4, 4, 5, 1, 4, 6, 2, 5,
                 6, 1, 6, 2, 2, 4, 3, 3, 5, 5, 6, 2, 5, 5, 3, 6]
        all_y = [6, 4, 4, 6, 6, 3, 1, 4, 4, 5, 6, 5, 2, 2, 5, 1,
                 4, 3, 5, 0, 3, 1, 1, 2, 4, 2, 1, 1, 5, 3, 3, 3]
    return all_x[:num_freq], all_y[:num_freq]


def _build_filter(pos, freq, POS):
    result = math.cos(math.pi * freq * (pos + 0.5) / POS) / math.sqrt(POS)
    return result if freq == 0 else result * math.sqrt(2)


def get_dct_filter(tile_x, tile_y, mapper_x, mapper_y, channel):
    dct_filter = np.zeros((channel, tile_x, tile_y), dtype=np.float32)
    c_part = channel // len(mapper_x)
    for i, (u_x, v_y) in enumerate(zip(mapper_x, mapper_y)):
        for t_x in range(tile_x):
            for t_y in range(tile_y):
                dct_filter[i * c_part:(i + 1) * c_part, t_x, t_y] = (
                    _build_filter(t_x, u_x, tile_x) * _build_filter(t_y, v_y, tile_y))
    return dct_filter


# ------------------------------------------ fold adaptive pool into DCT (host)
def _adaptive_pool_matrix(in_size, out_size):
    """(out, in) matrix P with pooled = P @ x along one axis.
    Matches torch adaptive_avg_pool2d binning (incl. non-divisible case)."""
    P = np.zeros((out_size, in_size), dtype=np.float64)
    for i in range(out_size):
        start = (i * in_size) // out_size
        end = -(-((i + 1) * in_size) // out_size)  # ceil
        P[i, start:end] = 1.0 / (end - start)
    return P


def _fold_pool_into_dct(dct_filter_np, h, w):
    """dct_full[c,h,w] = sum_ij P_h[i,h] * dct[c,i,j] * P_w[j,w]   (numpy, host).

    So  sum_hw x[c,h,w] * dct_full[c,h,w]
      == sum_ij adaptive_avg_pool2d(x)[c,i,j] * dct[c,i,j]."""
    P_h = _adaptive_pool_matrix(h, dct_filter_np.shape[1])
    P_w = _adaptive_pool_matrix(w, dct_filter_np.shape[2])
    return np.einsum('ih,cij,jw->chw', P_h,
                     dct_filter_np.astype(np.float64), P_w).astype(np.float32)


# ------------------------------------------------------------------- helpers
def _vmem_budget_bytes():
    """Scoped VMEM request, kept well below physical per-core capacity
    (v7x has only 64 MiB per TensorCore; a 100 MiB request would not compile)."""
    try:
        cap = int(pltpu.get_tpu_info().vmem_capacity_bytes)
    except Exception:
        cap = 64 * 1024 * 1024  # conservative default (v7x per-TC)
    return int(0.75 * cap)


def _const_spec(block_shape, single_buffer=True):
    """Resident constant: fixed block index; single-buffered when supported."""
    index_map = lambda i: (0,) * len(block_shape)
    if single_buffer:
        try:
            return pl.BlockSpec(block_shape, index_map,
                                pipeline_mode=pl.Buffered(1))
        except Exception:
            pass
    return pl.BlockSpec(block_shape, index_map)


def _pick_channel_tile(c, hw, itemsize, budget):
    """Largest divisor of C (multiple of 8, or C itself) whose tiled blocks fit."""
    smallest_valid = c
    for d in range(c, 0, -1):
        if c % d != 0 or not (d % 8 == 0 or d == c):
            continue
        smallest_valid = d
        need = 6 * d * hw * itemsize + (1 << 20)
        if need <= budget // 2:
            return d
    return smallest_valid


# --------------------------------------------------------------------- kernels
def _fused_kernel(x_ref, dct_ref, w1_ref, w2_ref, out_ref):
    # x_ref  : (1, C, HW)  one batch element, input dtype (the only x stream)
    # dct_ref: (C, HW)     pool-folded DCT filter, pre-cast to x dtype (resident)
    # w1_ref : (Cr, C)     first Linear weight (PyTorch (out,in) layout), f32
    # w2_ref : (C, Cr)     second Linear weight, f32
    # out_ref: (1, C, HW)
    xb = x_ref[...]

    # DCT channel descriptor: multiply in the input dtype, accumulate HW in f32.
    y = jnp.sum(xb[0] * dct_ref[...], axis=-1, dtype=jnp.float32)            # (C,)

    # Tiny 2-layer FC on the VPU (M=1 MXU matmuls would waste a full tile + MRF trip).
    hid = jnp.maximum(jnp.sum(w1_ref[...] * y[None, :], axis=-1), 0.0)       # (Cr,)
    s = jax.nn.sigmoid(jnp.sum(w2_ref[...] * hid[None, :], axis=-1,
                               keepdims=True))                               # (C, 1)

    # Streaming channel-wise rescale in the input dtype (C on sublanes -> no relayout).
    out_ref[...] = xb * s.astype(xb.dtype)[None, :, :]


def _descriptor_kernel(x_ref, dct_ref, y_ref):
    # x_ref: (1, ct, HW), dct_ref: (ct, HW), y_ref: (1, 1, 1, ct) f32
    y_ref[...] = jnp.sum(x_ref[0] * dct_ref[...], axis=-1,
                         dtype=jnp.float32)[None, None, None, :]


def _rescale_kernel(x_ref, s_ref, out_ref):
    # x_ref: (1, ct, HW), s_ref: (1, ct, 1) f32, out_ref: (1, ct, HW)
    out_ref[...] = x_ref[...] * s_ref[...].astype(x_ref.dtype)


# -------------------------------------------------------------------- module
class ChanelAttention:
    def __init__(self, channel, dct_h, dct_w, reduction=16,
                 freq_sel_method='top16', *, key=None):
        assert channel % reduction == 0
        self.channel, self.dct_h, self.dct_w = channel, dct_h, dct_w
        self.cr = channel // reduction

        mapper_x, mapper_y = get_freq_indices(freq_sel_method)
        assert channel % len(mapper_x) == 0
        mapper_x = [mx * (dct_h // 7) for mx in mapper_x]
        mapper_y = [my * (dct_w // 7) for my in mapper_y]
        self._dct_np = get_dct_filter(dct_h, dct_w, mapper_x, mapper_y, channel)

        if key is None:
            key = jax.random.PRNGKey(0)
        k1, k2 = jax.random.split(key)
        # PyTorch Linear weight layout (out, in); used directly by the VPU FC.
        self.w1 = jax.random.normal(k1, (self.cr, channel), jnp.float32) * 0.1
        self.w2 = jax.random.normal(k2, (channel, self.cr), jnp.float32) * 0.1

        self._dct_cache = {}   # (h, w, dtype name) -> jnp (C, H*W) folded filter

    # -------- cached, host-built folded DCT (no per-call einsum / HBM round trip)
    def folded_dct(self, h, w, dtype):
        key = (h, w, jnp.dtype(dtype).name)
        if key not in self._dct_cache:
            full = _fold_pool_into_dct(self._dct_np, h, w).reshape(self.channel, h * w)
            self._dct_cache[key] = jnp.asarray(full, dtype=dtype)
        return self._dct_cache[key]

    # ---------------------------------------------------------------- forward
    def __call__(self, x, *, force_split=False, channel_tile=None):
        n, c, h, w = x.shape
        assert c == self.channel
        hw = h * w
        dct = self.folded_dct(h, w, x.dtype)
        x_flat = x.reshape(n, c, hw)          # free reshape (contiguous)

        itemsize = jnp.dtype(x.dtype).itemsize
        budget = _vmem_budget_bytes()
        slab = c * hw * itemsize
        const_bytes = c * hw * itemsize + 2 * c * self.cr * 4
        # x-in + out double-buffered, constants counted twice in case Buffered(1)
        # is unsupported, plus slack.
        fused_need = 2 * 2 * slab + 2 * const_bytes + (1 << 20)

        if force_split or fused_need > budget:
            out_flat = self._split(x_flat, dct, budget, channel_tile)
        else:
            try:
                out_flat = self._fused(x_flat, dct, budget, fused_need,
                                       single_buffer_consts=True)
            except Exception:
                # Fallback if this JAX build rejects pl.Buffered on pallas_call specs.
                out_flat = self._fused(x_flat, dct, budget, fused_need,
                                       single_buffer_consts=False)
        return out_flat.reshape(n, c, h, w)

    # ------------------------- fused single-pass kernel (HBM-optimal: 2 slabs)
    def _fused(self, x_flat, dct, budget, need, *, single_buffer_consts):
        n, c, hw = x_flat.shape
        cr = self.cr
        itemsize = jnp.dtype(x_flat.dtype).itemsize
        vmem_limit = int(min(budget, max(16 << 20, 2 * need)))

        cost = pl.CostEstimate(
            flops=int(n * (3 * c * hw + 4 * c * cr)),
            transcendentals=int(n * c),
            bytes_accessed=int(2 * n * c * hw * itemsize
                               + c * hw * itemsize + 2 * c * cr * 4),
        )

        return pl.pallas_call(
            _fused_kernel,
            out_shape=jax.ShapeDtypeStruct((n, c, hw), x_flat.dtype),
            grid=(n,),
            in_specs=[
                pl.BlockSpec((1, c, hw), lambda i: (i, 0, 0)),
                _const_spec((c, hw), single_buffer_consts),
                _const_spec((cr, c), single_buffer_consts),
                _const_spec((c, cr), single_buffer_consts),
            ],
            out_specs=pl.BlockSpec((1, c, hw), lambda i: (i, 0, 0)),
            compiler_params=pltpu.CompilerParams(
                dimension_semantics=("parallel",),
                vmem_limit_bytes=vmem_limit),
            cost_estimate=cost,
        )(x_flat, dct, self.w1, self.w2)

    # -------- split path: channel-tiled descriptor + XLA FC + tiled rescale
    # Used when the monolithic slab won't double-buffer in VMEM (or forced); also
    # keeps both v7x TensorCores busy at N==1 via the fully-parallel (N, C/ct) grid.
    def _split(self, x_flat, dct, budget, channel_tile):
        n, c, hw = x_flat.shape
        itemsize = jnp.dtype(x_flat.dtype).itemsize
        if channel_tile is None:
            channel_tile = _pick_channel_tile(c, hw, itemsize, budget)
        ct = channel_tile
        assert c % ct == 0 and (ct % 8 == 0 or ct == c)
        n_ct = c // ct

        # Pass 1: per-channel DCT descriptor (reads x once).
        desc_need = 4 * ct * hw * itemsize + (1 << 20)
        vmem1 = int(min(budget, max(16 << 20, 2 * desc_need)))
        y_blocks = pl.pallas_call(
            _descriptor_kernel,
            out_shape=jax.ShapeDtypeStruct((n, n_ct, 1, ct), jnp.float32),
            grid=(n, n_ct),
            in_specs=[
                pl.BlockSpec((1, ct, hw), lambda i, j: (i, j, 0)),
                pl.BlockSpec((ct, hw), lambda i, j: (j, 0)),
            ],
            out_specs=pl.BlockSpec((1, 1, 1, ct), lambda i, j: (i, j, 0, 0)),
            compiler_params=pltpu.CompilerParams(
                dimension_semantics=("parallel", "parallel"),
                vmem_limit_bytes=vmem1),
        )(x_flat, dct)

        # Tiny FC in plain JAX (negligible next to the streaming passes).
        y = y_blocks.reshape(n, c)
        hid = jnp.maximum(y @ self.w1.T, 0.0)
        s = jax.nn.sigmoid(hid @ self.w2.T).reshape(n, c, 1)

        # Pass 2: channel-tiled streaming rescale (reads x + writes out).
        resc_need = 2 * 2 * 2 * ct * hw * itemsize + (1 << 20)
        vmem2 = int(min(budget, max(16 << 20, 2 * resc_need)))
        return pl.pallas_call(
            _rescale_kernel,
            out_shape=jax.ShapeDtypeStruct((n, c, hw), x_flat.dtype),
            grid=(n, n_ct),
            in_specs=[
                pl.BlockSpec((1, ct, hw), lambda i, j: (i, j, 0)),
                pl.BlockSpec((1, ct, 1), lambda i, j: (i, j, 0)),
            ],
            out_specs=pl.BlockSpec((1, ct, hw), lambda i, j: (i, j, 0)),
            compiler_params=pltpu.CompilerParams(
                dimension_semantics=("parallel", "parallel"),
                vmem_limit_bytes=vmem2),
        )(x_flat, s)


# -------------------------------------------------------------- pure-JAX ref
def chanel_attention_ref(x, module):
    n, c, h, w = x.shape
    dh, dw = module.dct_h, module.dct_w
    dct = jnp.asarray(module._dct_np)
    xf = x.astype(jnp.float32)
    if h != dh or w != dw:
        assert h % dh == 0 and w % dw == 0   # divisible case for the ref only
        xp = xf.reshape(n, c, dh, h // dh, dw, w // dw).mean(axis=(3, 5))
    else:
        xp = xf
    y = jnp.sum(xp * dct[None], axis=(2, 3))                    # (n, c)
    hid = jnp.maximum(y @ module.w1.T, 0.0)
    s = jax.nn.sigmoid(hid @ module.w2.T)
    return (xf * s[:, :, None, None]).astype(x.dtype)


# ----------------------------------------------------------------------- main
if __name__ == "__main__":
    # Module hyper-params (channel divisible by num_freq=16 and reduction=16)
    channel, reduction = 32, 16
    dct_h = dct_w = 7
    batch = 2

    key = jax.random.PRNGKey(0)
    kmod, kx1, kx2 = jax.random.split(key, 3)
    attn = ChanelAttention(channel, dct_h, dct_w, reduction=reduction,
                           freq_sel_method='top16', key=kmod)

    # Case 1: spatial == (dct_h, dct_w) -> adaptive pooling is the identity.
    x1 = jax.random.normal(kx1, (batch, channel, dct_h, dct_w), jnp.float32)
    out1 = jax.block_until_ready(attn(x1))
    ref1 = chanel_attention_ref(x1, attn)
    assert out1.shape == x1.shape
    assert jnp.allclose(out1, ref1, rtol=1e-3, atol=1e-3), "mismatch (no-pool case)"

    # Case 2: spatial (14,14) -> adaptive pooling folded into the DCT filter.
    x2 = jax.random.normal(kx2, (batch, channel, 14, 14), jnp.float32)
    out2 = jax.block_until_ready(attn(x2))
    ref2 = chanel_attention_ref(x2, attn)
    assert out2.shape == x2.shape
    assert jnp.allclose(out2, ref2, rtol=1e-3, atol=1e-3), "mismatch (pooled case)"

    # Case 3: force the split (big-slab / dual-TensorCore) path, tiled over channels.
    out3 = jax.block_until_ready(attn(x2, force_split=True, channel_tile=8))
    assert jnp.allclose(out3, ref2, rtol=1e-3, atol=1e-3), "mismatch (split path)"

    print("KERNEL_OK")
</pallas_src>

<mosaic_0001>
module attributes {stable_mosaic.version = 11 : i64} {
  func.func @_fused_kernel(%arg0: i32, %arg1: memref<1x32x49xf32, #tpu.memory_space<vmem>>, %arg2: memref<32x49xf32, #tpu.memory_space<vmem>>, %arg3: memref<2x32xf32, #tpu.memory_space<vmem>>, %arg4: memref<32x2xf32, #tpu.memory_space<vmem>>, %arg5: memref<1x32x49xf32, #tpu.memory_space<vmem>>) attributes {dimension_semantics = [#tpu.dimension_semantics<parallel>], iteration_bounds = array<i64: 2>, scalar_prefetch = 0 : i64, scratch_operands = 0 : i64, tpu.core_type = #tpu.core_type<tc>, window_params = [{transform_indices = @transform_0, window_bounds = array<i64: 1, 32, 49>}, {pipeline_mode = #tpu.pipeline_mode<synchronous>, transform_indices = @transform_1, window_bounds = array<i64: 32, 49>}, {pipeline_mode = #tpu.pipeline_mode<synchronous>, transform_indices = @transform_2, window_bounds = array<i64: 2, 32>}, {pipeline_mode = #tpu.pipeline_mode<synchronous>, transform_indices = @transform_3, window_bounds = array<i64: 32, 2>}, {transform_indices = @transform_4, window_bounds = array<i64: 1, 32, 49>}]} {
    %c0 = arith.constant 0 : index
    %c0_0 = arith.constant 0 : index
    %c0_1 = arith.constant 0 : index
    %0 = vector.load %arg1[%c0, %c0_0, %c0_1] : memref<1x32x49xf32, #tpu.memory_space<vmem>>, vector<1x32x49xf32>
    %1 = vector.shape_cast %0 : vector<1x32x49xf32> to vector<32x49xf32>
    %c0_2 = arith.constant 0 : index
    %c0_3 = arith.constant 0 : index
    %2 = vector.load %arg2[%c0_2, %c0_3] : memref<32x49xf32, #tpu.memory_space<vmem>>, vector<32x49xf32>
    %3 = arith.mulf %1, %2 : vector<32x49xf32>
    %cst = arith.constant dense<0.000000e+00> : vector<32xf32>
    %4 = vector.multi_reduction <add>, %3, %cst [1] : vector<32x49xf32> to vector<32xf32>
    %c0_4 = arith.constant 0 : index
    %c0_5 = arith.constant 0 : index
    %5 = vector.load %arg3[%c0_4, %c0_5] : memref<2x32xf32, #tpu.memory_space<vmem>>, vector<2x32xf32>
    %6 = vector.shape_cast %4 : vector<32xf32> to vector<1x32xf32>
    %7 = vector.broadcast %6 : vector<1x32xf32> to vector<2x32xf32>
    %8 = arith.mulf %5, %7 : vector<2x32xf32>
    %cst_6 = arith.constant dense<0.000000e+00> : vector<2xf32>
    %9 = vector.multi_reduction <add>, %8, %cst_6 [1] : vector<2x32xf32> to vector<2xf32>
    %cst_7 = arith.constant 0.000000e+00 : f32
    %10 = vector.broadcast %cst_7 : f32 to vector<2xf32>
    %11 = arith.maximumf %9, %10 : vector<2xf32>
    %c0_8 = arith.constant 0 : index
    %c0_9 = arith.constant 0 : index
    %12 = vector.load %arg4[%c0_8, %c0_9] : memref<32x2xf32, #tpu.memory_space<vmem>>, vector<32x2xf32>
    %13 = vector.shape_cast %11 : vector<2xf32> to vector<1x2xf32>
    %14 = vector.broadcast %13 : vector<1x2xf32> to vector<32x2xf32>
    %15 = arith.mulf %12, %14 : vector<32x2xf32>
    %cst_10 = arith.constant dense<0.000000e+00> : vector<32xf32>
    %16 = vector.multi_reduction <add>, %15, %cst_10 [1] : vector<32x2xf32> to vector<32xf32>
    %17 = vector.shape_cast %16 : vector<32xf32> to vector<32x1xf32>
    %18 = arith.negf %17 : vector<32x1xf32>
    %19 = math.exp %18 : vector<32x1xf32>
    %cst_11 = arith.constant 1.000000e+00 : f32
    %20 = vector.broadcast %cst_11 : f32 to vector<32x1xf32>
    %21 = arith.addf %20, %19 : vector<32x1xf32>
    %22 = arith.divf %20, %21 : vector<32x1xf32>
    %23 = vector.shape_cast %22 : vector<32x1xf32> to vector<1x32x1xf32>
    %24 = vector.broadcast %23 : vector<1x32x1xf32> to vector<1x32x49xf32>
    %25 = arith.mulf %0, %24 : vector<1x32x49xf32>
    %c0_12 = arith.constant 0 : index
    %c0_13 = arith.constant 0 : index
    %c0_14 = arith.constant 0 : index
    %26 = vector.load %arg5[%c0_12, %c0_13, %c0_14] : memref<1x32x49xf32, #tpu.memory_space<vmem>>, vector<1x32x49xf32>
    tpu.vector_store %arg5[%c0_12, %c0_13, %c0_14], %25 {strides = array<i32>} : memref<1x32x49xf32, #tpu.memory_space<vmem>>, vector<1x32x49xf32>,
    return
  }
  func.func @transform_0(%arg0: i32) -> (i32, i32, i32) {
    %c0_i32 = arith.constant 0 : i32
    %c0_i32_0 = arith.constant 0 : i32
    %c0_i32_1 = arith.constant 0 : i32
    return %arg0, %c0_i32, %c0_i32_0 : i32, i32, i32
  }
  func.func @transform_1(%arg0: i32) -> (i32, i32) {
    %c0_i32 = arith.constant 0 : i32
    %c0_i32_0 = arith.constant 0 : i32
    %c0_i32_1 = arith.constant 0 : i32
    return %c0_i32, %c0_i32_0 : i32, i32
  }
  func.func @transform_2(%arg0: i32) -> (i32, i32) {
    %c0_i32 = arith.constant 0 : i32
    %c0_i32_0 = arith.constant 0 : i32
    %c0_i32_1 = arith.constant 0 : i32
    return %c0_i32, %c0_i32_0 : i32, i32
  }
  func.func @transform_3(%arg0: i32) -> (i32, i32) {
    %c0_i32 = arith.constant 0 : i32
    %c0_i32_0 = arith.constant 0 : i32
    %c0_i32_1 = arith.constant 0 : i32
    return %c0_i32, %c0_i32_0 : i32, i32
  }
  func.func @transform_4(%arg0: i32) -> (i32, i32, i32) {
    %c0_i32 = arith.constant 0 : i32
    %c0_i32_0 = arith.constant 0 : i32
    %c0_i32_1 = arith.constant 0 : i32
    return %arg0, %c0_i32, %c0_i32_0 : i32, i32, i32
  }
}

module attributes {stable_mosaic.version = 11 : i64} {
  func.func @_fused_kernel(%arg0: i32, %arg1: memref<1x32x49xf32, #tpu.memory_space<vmem>>, %arg2: memref<32x49xf32, #tpu.memory_space<vmem>>, %arg3: memref<2x32xf32, #tpu.memory_space<vmem>>, %arg4: memref<32x2xf32, #tpu.memory_space<vmem>>, %arg5: memref<1x32x49xf32, #tpu.memory_space<vmem>>) attributes {dimension_semantics = [#tpu.dimension_semantics<parallel>], iteration_bounds = array<i64: 2>, scalar_prefetch = 0 : i64, scratch_operands = 0 : i64, tpu.core_type = #tpu.core_type<tc>, window_params = [{transform_indices = @transform_0, window_bounds = array<i64: 1, 32, 49>}, {pipeline_mode = #tpu.pipeline_mode<synchronous>, transform_indices = @transform_1, window_bounds = array<i64: 32, 49>}, {pipeline_mode = #tpu.pipeline_mode<synchronous>, transform_indices = @transform_2, window_bounds = array<i64: 2, 32>}, {pipeline_mode = #tpu.pipeline_mode<synchronous>, transform_indices = @transform_3, window_bounds = array<i64: 32, 2>}, {transform_indices = @transform_4, window_bounds = array<i64: 1, 32, 49>}]} {
    %c0 = arith.constant 0 : index
    %c0_0 = arith.constant 0 : index
    %c0_1 = arith.constant 0 : index
    %0 = vector.load %arg1[%c0, %c0_0, %c0_1] : memref<1x32x49xf32, #tpu.memory_space<vmem>>, vector<1x32x49xf32>
    %1 = vector.shape_cast %0 : vector<1x32x49xf32> to vector<32x49xf32>
    %c0_2 = arith.constant 0 : index
    %c0_3 = arith.constant 0 : index
    %2 = vector.load %arg2[%c0_2, %c0_3] : memref<32x49xf32, #tpu.memory_space<vmem>>, vector<32x49xf32>
    %3 = arith.mulf %1, %2 : vector<32x49xf32>
    %cst = arith.constant dense<0.000000e+00> : vector<32xf32>
    %4 = vector.multi_reduction <add>, %3, %cst [1] : vector<32x49xf32> to vector<32xf32>
    %c0_4 = arith.constant 0 : index
    %c0_5 = arith.constant 0 : index
    %5 = vector.load %arg3[%c0_4, %c0_5] : memref<2x32xf32, #tpu.memory_space<vmem>>, vector<2x32xf32>
    %6 = vector.shape_cast %4 : vector<32xf32> to vector<1x32xf32>
    %7 = vector.broadcast %6 : vector<1x32xf32> to vector<2x32xf32>
    %8 = arith.mulf %5, %7 : vector<2x32xf32>
    %cst_6 = arith.constant dense<0.000000e+00> : vector<2xf32>
    %9 = vector.multi_reduction <add>, %8, %cst_6 [1] : vector<2x32xf32> to vector<2xf32>
    %cst_7 = arith.constant 0.000000e+00 : f32
    %10 = vector.broadcast %cst_7 : f32 to vector<2xf32>
    %11 = arith.maximumf %9, %10 : vector<2xf32>
    %c0_8 = arith.constant 0 : index
    %c0_9 = arith.constant 0 : index
    %12 = vector.load %arg4[%c0_8, %c0_9] : memref<32x2xf32, #tpu.memory_space<vmem>>, vector<32x2xf32>
    %13 = vector.shape_cast %11 : vector<2xf32> to vector<1x2xf32>
    %14 = vector.broadcast %13 : vector<1x2xf32> to vector<32x2xf32>
    %15 = arith.mulf %12, %14 : vector<32x2xf32>
    %cst_10 = arith.constant dense<0.000000e+00> : vector<32xf32>
    %16 = vector.multi_reduction <add>, %15, %cst_10 [1] : vector<32x2xf32> to vector<32xf32>
    %17 = vector.shape_cast %16 : vector<32xf32> to vector<32x1xf32>
    %18 = arith.negf %17 : vector<32x1xf32>
    %19 = math.exp %18 : vector<32x1xf32>
    %cst_11 = arith.constant 1.000000e+00 : f32
    %20 = vector.broadcast %cst_11 : f32 to vector<32x1xf32>
    %21 = arith.addf %20, %19 : vector<32x1xf32>
    %22 = arith.divf %20, %21 : vector<32x1xf32>
    %23 = vector.shape_cast %22 : vector<32x1xf32> to vector<1x32x1xf32>
    %24 = vector.broadcast %23 : vector<1x32x1xf32> to vector<1x32x49xf32>
    %25 = arith.mulf %0, %24 : vector<1x32x49xf32>
    %c0_12 = arith.constant 0 : index
    %c0_13 = arith.constant 0 : index
    %c0_14 = arith.constant 0 : index
    %26 = vector.load %arg5[%c0_12, %c0_13, %c0_14] : memref<1x32x49xf32, #tpu.memory_space<vmem>>, vector<1x32x49xf32>
    tpu.vector_store %arg5[%c0_12, %c0_13, %c0_14], %25 {strides = array<i32>} : memref<1x32x49xf32, #tpu.memory_space<vmem>>, vector<1x32x49xf32>,
    return
  }
  func.func @transform_0(%arg0: i32) -> (i32, i32, i32) {
    %c0_i32 = arith.constant 0 : i32
    %c0_i32_0 = arith.constant 0 : i32
    %c0_i32_1 = arith.constant 0 : i32
    return %arg0, %c0_i32, %c0_i32_0 : i32, i32, i32
  }
  func.func @transform_1(%arg0: i32) -> (i32, i32) {
    %c0_i32 = arith.constant 0 : i32
    %c0_i32_0 = arith.constant 0 : i32
    %c0_i32_1 = arith.constant 0 : i32
    return %c0_i32, %c0_i32_0 : i32, i32
  }
  func.func @transform_2(%arg0: i32) -> (i32, i32) {
    %c0_i32 = arith.constant 0 : i32
    %c0_i32_0 = arith.constant 0 : i32
    %c0_i32_1 = arith.constant 0 : i32
    return %c0_i32, %c0_i32_0 : i32, i32
  }
  func.func @transform_3(%arg0: i32) -> (i32, i32) {
    %c0_i32 = arith.constant 0 : i32
    %c0_i32_0 = arith.constant 0 : i32
    %c0_i32_1 = arith.constant 0 : i32
    return %c0_i32, %c0_i32_0 : i32, i32
  }
  func.func @transform_4(%arg0: i32) -> (i32, i32, i32) {
    %c0_i32 = arith.constant 0 : i32
    %c0_i32_0 = arith.constant 0 : i32
    %c0_i32_1 = arith.constant 0 : i32
    return %arg0, %c0_i32, %c0_i32_0 : i32, i32, i32
  }
}

</mosaic_0001>

<bundles_post_ra>
// kernel: tpu_custom_call.1
= control target key start
LH: loop header
LB: loop body
LE: loop exit
PB: predicated region body
PF: predicated region fallthrough
CT: control target
= control target key end

     0   :  { %9 = vsyncpa [#allocation3], 0  ;;  %s870_s0 = inlined_call_operand.hbm [shape: f32[2,32,49], index: 0, kind: input, shape index: {}]   ;;  %s871_s1 = inlined_call_operand.vmem [shape: f32[32,49], index: 1, kind: input, shape index: {}]   ;;  %s872_s2 = inlined_call_operand.vmem [shape: f32[2,32], index: 2, kind: input, shape index: {}]   ;;  %s873_s3 = inlined_call_operand.vmem [shape: f32[32,2], index: 3, kind: input, shape index: {}]   ;;  %s874_s4 = inlined_call_operand.hbm [shape: f32[2,32,49], index: 4, kind: output, shape index: {}]  }
   0x1   :  { %11 = vsyncpa [#allocation3 + $0x1], 0 }
   0x2   :  { %12 = vsyncpa [#allocation4], 0 }
   0x3   :  { %14 = vsyncpa [#allocation4 + $0x1], 0  ;;  %s653_s15 = smov 0   ;;  %s655_s16 = smov 0  }
   0x4   :  { %s657_s17 = smov 0   ;;  %s659_s18 = smov 0  }
   0x5 LB: > { %s674_s19 = sadd.s32 4294967295, %s620_s18   ;;  %s438_s20 = sadd.s32 4294967294, %s620_s18   ;;  %s620_s18 = sphi %s659_s18, %s887_s18   ;;  %s616_s17 = sphi %s657_s17, %s886_s17   ;;  %s612_s16 = sphi %s655_s16, %s885_s16   ;;  %s608_s15 = sphi %s653_s15, %s884_s15  }
   0x6   : > { %s678_s21 = sadd.s32 1, %s620_s18   ;;  %s27_s22 = sadd.s32 1, %s616_s17 }
   0x7   : > { %s24_s23 = ssub.s32 %s620_s18, %s678_s21  ;;  %p34_p0 = scmp.ne.s32.totalorder %s616_s17, %s612_s16 }
   0x8   : > { %p25_p1 = scmp.eq.s32.totalorder %s24_s23, 0  ;;  %p35_p2 = scmp.eq.s32.totalorder %s620_s18, 0 }
   0x9   : > { %p40_p3 = scmp.ne.s32.totalorder %s612_s16, %s608_s15  ;;  %p41_p4 = scmp.eq.s32.totalorder %s674_s19, 0 }
   0xa   : > { %s690_s24 = scalar_select %p25_p1, %s616_s17, %s27_s22  }
   0xb   : > { %p692_p5 = por %p35_p2, %p34_p0  ;;  %p696_p6 = por %p41_p4, %p40_p3 }
   0xc   : > { %p127_p7 = scmp.eq.s32.totalorder %s674_s19, 1  ;;  %p133_p8 = scmp.eq.s32.totalorder %s438_s20, 1 }
   0xd   : > { %p470_p10 = scmp.lt.s32.totalorder %s620_s18, 2  ;;  %s162_s29 = sand.u32 1, %s616_s17  }
   0xe   : > { %p703_p11 = por %p127_p7, %p34_p0  ;;  %p707_p12 = por %p133_p8, %p40_p3 }
   0xf   : > { %s456_s30 = sshll.u32 %s620_s18, 9  ;;  %s441_s5 = sshll.u32 %s162_s29, 5 }
  0x10   : > { %s878_s27 = scalar_select %p703_p11, 1, 0 }
  0x11   : > { %s879_s28 = scalar_select %p707_p12, 1, 0 }
  0x12   : > { %s716_s8 = scalar_lea.hbm %s870_s0, %s456_s30  ;;  %s166_s9 = scalar_lea.vmem [#allocation2], %s441_s5 }
  0x13   : > { %s173_s10 = sshll.u32 %s166_s9, 4  ;;  %p720_p13 = pnand %p470_p10, %p692_p5  ;;  %s724_s10 = int_to_ptr.vmem [resolvable:$true] %s173_s10 }
  0x14   : > { %s726_s12 = scalar_lea.sflag [#allocation3], %s162_s29  ;;  %s524_s13 = scalar_lea.hbm %s716_s8, 512 }
  0x15   : > { %p525_p0 = scmp.ne.s32.totalorder %s716_s8, %s524_s13  ;;  %p526_p1 = pneg %p720_p13 }
  0x16   : > { %s529_s22 = scalar_lea.hbm %s870_s0, 1024  ;;  %p530_p4 = scmp.lt.u32.totalorder %s716_s8, %s870_s0 }
  0x17   : > { %p527_p2 = pnand %p526_p1, %p525_p0  ;;  %p531_p5 = scmp.lt.u32.totalorder %s529_s22, %s524_s13 }
  0x18   : > { %p533_p8 = scmp.lt.u32.totalorder %s524_s13, %s716_s8 }
  0x19   : > { %p528_p3 = pneg %p527_p2  ;;  %p532_p7 = por %p531_p5, %p530_p4 }
  0x1b   : > { %p534_p10 = por %p533_p8, %p532_p7 }
  0x1d   : > { %p535_p9 = pnand %p534_p10, %p528_p3 }
  0x1f   : > { %538 = shalt.err (!%p535_p9)
}
  0x20   : > { %s539_s29 = scalar_lea.vmem %s724_s10, 512  ;;  %s622_s30 = smov [#allocation2]  }
  0x21   : > { %p540_p0 = scmp.ne.s32.totalorder %s724_s10, %s539_s29  ;;  %s544_s5 = sshll.u32 %s622_s30, 4  ;;  %s545_s5 = int_to_ptr.vmem [resolvable:$false] %s544_s5 }
  0x22   : > { %s546_s6 = scalar_lea.vmem %s545_s5, 1024  ;;  %p547_p11 = scmp.lt.s32.totalorder %s724_s10, %s545_s5 }
  0x23   : > { %p542_p2 = pnand %p540_p0, %p526_p1  ;;  %p548_p4 = scmp.lt.s32.totalorder %s546_s6, %s539_s29 }
  0x25   : > { %p543_p12 = pneg %p542_p2  ;;  %p549_p5 = por %p548_p4, %p547_p11 }
  0x27   : > { %p550_p7 = pnand %p549_p5, %p543_p12 }
  0x29   : > { %553 = shalt.err (!%p550_p7)
}
  0x2a   : > { %s623_s7 = smov 128   ;;  %s624_s9 = smov 8  }
  0x2b   : > { %465 = dma.hbm_to_vmem [thread:$0]  (!%p720_p13), %s716_s8, 512, %s724_s10, %s726_s12, %s623_s7, %s623_s7, %s624_s9  }
  0x2c   : > { %p444_p9 = scmp.ge.s32.totalorder %s620_s18, 1  ;;  %p181_p1 = scmp.lt.s32.totalorder %s620_s18, 3 }
  0x2e   : > { %p182_p3 = pnand %p444_p9, %p181_p1 }
  0x2f   : > { %s757_s13 = sand.u32 (!%p182_p3), 1, %s612_s16  }
  0x30   : > { %185 = sbr.rel (%p182_p3) target bundleno = 554 (0x22a), region = 36  ;;  %s445_s14 = sshll.u32 (!%p182_p3), %s757_s13, 5 }
  0x31   : > { %s188_s20 = scalar_lea.sflag (!%p182_p3), [#allocation3], %s757_s13  ;;  %s191_s22 = scalar_lea.vmem (!%p182_p3), [#allocation2], %s445_s14 }
  0x37   : > { %599 = dma.done.wait (%p696_p6), %s188_s20, 512  }
  0x38   : > { %601 = vsyncadd (%p696_p6), %s188_s20, 4294966784  ;;  %v767_v0 = vld [vmem:[%s191_s22] sm:$0xff]  ;;  %vm228_vm0 = vcmask 400384   ;;  %v772_v2 = vld [vmem:[%s191_s22 + $0x10] sm:$0xff]  ;;  %v246_v16 = vlaneseq  ;;  %vm257_vm1 = vcmask 130112   ;;  %vm264_vm2 = vcmask 195712  }
  0x39   : > { %v220_v1 = vld [vmem:[%s871_s1] sm:$0xff]  ;;  %v222_v4 = vld [vmem:[%s871_s1 + $0x10] sm:$0xff]  ;;  %v778_v5 = vld [vmem:[%s191_s22 + $0x8] sm:$0xff]  ;;  %vm271_vm3 = vcmask 261312   ;;  %vm275_vm4 = vcmask 254976   ;;  %vm306_vm5 = vcmask 15360  }
  0x3a   : > { %v224_v3 = vmul.f32 %v220_v1, %v767_v0  ;;  %v221_v6 = vld [vmem:[%s871_s1 + $0x8] sm:$0xff]  ;;  %v226_v7 = vmul.f32 %v222_v4, %v772_v2  ;;  %v785_v9 = vld [vmem:[%s191_s22 + $0x18] sm:$0xff]  ;;  %v247_v17 = vand.u32 127, %v246_v16  ;;  %v249_v18 = vshrl.u32 %v246_v16, 7  ;;  %v241_v35 = vld [vmem:[%s872_s2] sm:$0x3] }
  0x3b   : > { %v225_v8 = vmul.f32 %v221_v6, %v778_v5  ;;  %v223_v10 = vld [vmem:[%s871_s1 + $0x18] sm:$0xff]  ;;  %v281_v42 = vld [vmem:[%s873_s3 + $0x8] sm:$0xff]  ;;  %v280_v43 = vld [vmem:[%s873_s3] sm:$0xff]  ;;  %s457_s12 = sshll.u32 %s674_s19, 9  ;;  %s215_s23 = scalar_lea.vmem [#allocation5], %s445_s14 }
  0x3c   : > { %v229_v11 = vsel %vm228_vm0, %v224_v3, 0.0  ;;  %v227_v12 = vmul.f32 %v223_v10, %v785_v9  ;;  %v235_v13 = vsel %vm228_vm0, %v226_v7, 0.0  ;;  %v252_v19 = vadd.s32 4294967288, %v247_v17  ;;  %v283_v45 = vld [vmem:[%s873_s3 + $0x18] sm:$0xff]  ;;  %v282_v46 = vld [vmem:[%s873_s3 + $0x10] sm:$0xff]  ;;  %s365_s26 = sshll.u32 %s215_s23, 4  ;;  %s821_s30 = scalar_lea.hbm %s874_s4, %s457_s12  ;;  %s823_s26 = int_to_ptr.vmem [resolvable:$true] %s365_s26 }
  0x3d   : > { %230 = vadd.xlane.f32.xlu0 %v229_v11  ;;  %236 = vadd.xlane.f32.xlu1 %v235_v13  ;;  %v232_v14 = vsel %vm228_vm0, %v225_v8, 0.0  ;;  %v259_v20 = vadd.s32 4294967280, %v247_v17  ;;  %v266_v21 = vadd.s32 4294967272, %v247_v17  ;;  %v250_v23 = vsub.s32 %v247_v17, %v249_v18  ;;  %s352_s19 = scalar_lea.sflag [#allocation4], %s757_s13  ;;  %s554_s14 = scalar_lea.vmem %s823_s26, 512 }
  0x3e   : > { %v238_v15 = vsel %vm228_vm0, %v227_v12, 0.0  ;;  %v255_v25 = vsub.s32 %v252_v19, %v249_v18  ;;  %p555_p6 = scmp.ne.s32.totalorder %s823_s26, %s554_s14  ;;  %p881_p11 = scmp.ne.s32.totalorder %s878_s27, 0 }
  0x3f   : > { %v262_v26 = vsub.s32 %v259_v20, %v249_v18  ;;  %v269_v27 = vsub.s32 %v266_v21, %v249_v18  ;;  %s625_s5 = smov [#allocation5]  }
  0x40   : > { %p556_p12 = pnand %p555_p6, %p881_p11  ;;  %s558_s6 = sshll.u32 %s625_s5, 4  ;;  %s559_s6 = int_to_ptr.vmem [resolvable:$false] %s558_s6 }
  0x41   : > { %233 = vadd.xlane.f32.xlu0 %v232_v14  ;;  %239 = vadd.xlane.f32.xlu1 %v238_v15  ;;  %s560_s7 = scalar_lea.vmem %s559_s6, 1024  ;;  %p561_p8 = scmp.lt.s32.totalorder %s823_s26, %s559_s6 }
  0x42   : > { %p557_p13 = pneg %p556_p12  ;;  %p562_p10 = scmp.lt.s32.totalorder %s560_s7, %s554_s14 }
  0x44   : > { %p563_p0 = por %p562_p10, %p561_p8 }
  0x46   : > { %p564_p2 = pnand %p563_p0, %p557_p13 }
  0xca   : > { %v231_v22 = vpop.xlane.xlu0 %230  ;;  %v237_v24 = vpop.xlane.xlu1 %236 }
  0xcb   : > { %v251_v29 = vrot.slane %v231_v22, %v250_v23  ;;  %v263_v32 = vrot.slane %v237_v24, %v262_v26 }
  0xce   : > { %v234_v28 = vpop.xlane.xlu0 %233  ;;  %v240_v31 = vpop.xlane.xlu1 %239 }
  0xcf   : > { %v256_v30 = vrot.slane %v234_v28, %v255_v25  ;;  %v270_v33 = vrot.slane %v240_v31, %v269_v27 }
  0xd1   : > { %v258_v34 = vsel %vm257_vm1, %v256_v30, %v251_v29 }
  0xd2   : > { %v265_v36 = vsel %vm264_vm2, %v263_v32, %v258_v34 }
  0xd3   : > { %v272_v37 = vsel %vm271_vm3, %v270_v33, %v265_v36 }
  0xd4   : > { %v274_v38 = vmul.f32 %v272_v37, %v241_v35 }
  0xd6   : > { %v276_v39 = vsel %vm275_vm4, %v274_v38, 0.0 }
  0xd7   : > { %277 = vadd.xlane.f32.xlu0 %v276_v39 }
 0x164   : > { %v278_v40 = vpop.xlane.xlu0 %277 }
 0x165   : > { %v279_v41 = vmax.f32 %v278_v40, 0.0 }
 0x167   : > { %v288_v44 = vrot.slane %v279_v41, %v250_v23 }
 0x169   : > { %v303_v47 = vmul.f32 %v288_v44, %v281_v42  ;;  %v302_v48 = vmul.f32 %v288_v44, %v280_v43  ;;  %v305_v51 = vmul.f32 %v288_v44, %v283_v45  ;;  %v304_v52 = vmul.f32 %v288_v44, %v282_v46 }
 0x16b   : > { %v310_v49 = vsel %vm306_vm5, %v303_v47, 0.0  ;;  %v307_v50 = vsel %vm306_vm5, %v302_v48, 0.0  ;;  %v316_v53 = vsel %vm306_vm5, %v305_v51, 0.0  ;;  %v313_v54 = vsel %vm306_vm5, %v304_v52, 0.0 }
 0x16c   : > { %311 = vadd.xlane.f32.xlu0 %v310_v49  ;;  %308 = vadd.xlane.f32.xlu1 %v307_v50 }
 0x170   : > { %317 = vadd.xlane.f32.xlu0 %v316_v53  ;;  %314 = vadd.xlane.f32.xlu1 %v313_v54 }
 0x1f9   : > { %v312_v55 = vpop.xlane.xlu0 %311  ;;  %v309_v56 = vpop.xlane.xlu1 %308 }
 0x1fa   : > { %v448_v57 = vmul.f32 -1.442695, %v312_v55  ;;  %v447_v58 = vmul.f32 -1.442695, %v309_v56 }
 0x1fc   : > { %508 = vpow2.f32 %v448_v57 }
 0x1fd   : > { %510 = vpow2.f32 %v447_v58  ;;  %v318_v59 = vpop.xlane.xlu0 %317  ;;  %v315_v60 = vpop.xlane.xlu1 %314 }
 0x1fe   : > { %v450_v61 = vmul.f32 -1.442695, %v318_v59  ;;  %v449_v62 = vmul.f32 -1.442695, %v315_v60 }
 0x200   : > { %512 = vpow2.f32 %v450_v61 }
 0x201   : > { %514 = vpow2.f32 %v449_v62 }
 0x206   : > { %v509_v63 = vpop.eup %508 }
 0x207   : > { %v511_v1 = vpop.eup %510  ;;  %v332_v3 = vadd.f32 1.0, %v509_v63 }
 0x208   : > { %v331_v4 = vadd.f32 1.0, %v511_v1 }
 0x209   : > { %516 = vrcp.f32 %v332_v3 }
 0x20a   : > { %v513_v6 = vpop.eup %512  ;;  %518 = vrcp.f32 %v331_v4 }
 0x20b   : > { %v515_v7 = vpop.eup %514  ;;  %v334_v8 = vadd.f32 1.0, %v513_v6 }
 0x20c   : > { %v333_v10 = vadd.f32 1.0, %v515_v7 }
 0x20d   : > { %520 = vrcp.f32 %v334_v8 }
 0x20e   : > { %522 = vrcp.f32 %v333_v10 }
 0x213   : > { %v517_v11 = vpop.eup %516 }
 0x214   : > { %v519_v12 = vpop.eup %518  ;;  %v344_v13 = vmul.f32 %v517_v11, %v778_v5 }
 0x215   : > { %v343_v14 = vmul.f32 %v519_v12, %v767_v0 }
 0x216   : > { %348 = vst.msk [vmem:[%s215_s23 + $0x8] sm:$0xff] %vm228_vm0, %v344_v13 }
 0x217   : > { %v521_v15 = vpop.eup %520  ;;  %347 = vst.msk [vmem:[%s215_s23] sm:$0xff] %vm228_vm0, %v343_v14 }
 0x218   : > { %v523_v16 = vpop.eup %522  ;;  %v346_v17 = vmul.f32 %v521_v15, %v785_v9 }
 0x219   : > { %v345_v0 = vmul.f32 %v523_v16, %v772_v2 }
 0x21a   : > { %350 = vst.msk [vmem:[%s215_s23 + $0x18] sm:$0xff] %vm228_vm0, %v346_v17 }
 0x21b   : > { %349 = vst.msk [vmem:[%s215_s23 + $0x10] sm:$0xff] %vm228_vm0, %v345_v0 }
 0x21c   : > { %567 = shalt.err (!%p564_p2)
}
 0x21d   : > { %s568_s9 = scalar_lea.hbm %s821_s30, 512  ;;  %s572_s8 = scalar_lea.hbm %s874_s4, 1024 }
 0x21e   : > { %p569_p4 = scmp.ne.s32.totalorder %s821_s30, %s568_s9  ;;  %p573_p9 = scmp.lt.u32.totalorder %s821_s30, %s874_s4 }
 0x21f   : > { %p574_p1 = scmp.lt.u32.totalorder %s572_s8, %s568_s9  ;;  %p576_p6 = scmp.lt.u32.totalorder %s568_s9, %s821_s30 }
 0x220   : > { %p570_p5 = pnand %p569_p4, %p881_p11 }
 0x221   : > { %p575_p3 = por %p574_p1, %p573_p9 }
 0x222   : > { %p571_p7 = pneg %p570_p5 }
 0x223   : > { %p577_p12 = por %p576_p6, %p575_p3 }
 0x225   : > { %p578_p13 = pnand %p577_p12, %p571_p7 }
 0x227   : > { %581 = shalt.err (!%p578_p13)
}
 0x228   : > { %s626_s12 = smov 128   ;;  %s627_s23 = smov 8  }
 0x229   : > { %460 = dma.vmem_to_hbm [thread:$0]  (%p881_p11), %s823_s26, 512, %s821_s30, %s352_s19, %s626_s12, %s626_s12, %s627_s23  }
 0x22a PF: > { %s380_s25 = sand.u32 1, %s608_s15   ;;  %p882_p8 = scmp.ne.s32.totalorder %s879_s28, 0 }
 0x22b   : > { %p883_p10 = scmp.ge.s32.totalorder %s620_s18, 2  ;;  %s381_s29 = scalar_lea.sflag [#allocation4], %s380_s25 }
 0x22d   : > { %p467_p0 = pnand %p883_p10, %p882_p8 }
 0x22f   : > { %603 = dma.done.wait (!%p467_p0), %s381_s29, 512  }
 0x230   : > { %605 = vsyncadd (!%p467_p0), %s381_s29, 4294966784  ;;  %p17_p2 = scmp.ge.s32.totalorder %s678_s21, 4   ;;  %s884_s15 = smov %s612_s16 }
 0x231   : > { %s885_s16 = smov %s616_s17  ;;  %s886_s17 = smov %s690_s24 }
 0x232   : > { %s887_s18 = smov %s678_s21  ;;  %19 = sbr.rel (!%p17_p2) target bundleno = 5 (0x5), region = 81 }
 0x239   :  { %386 = vsyncpa [#allocation3], 1 }
 0x23a   :  { %388 = vsyncpa [#allocation3 + $0x1], 1 }
 0x23b   :  { %389 = vsyncpa [#allocation4], 1 }
 0x23c   :  { %391 = vsyncpa [#allocation4 + $0x1], 1 }

// kernel: tpu_custom_call.1
= control target key start
LH: loop header
LB: loop body
LE: loop exit
PB: predicated region body
PF: predicated region fallthrough
CT: control target
= control target key end

     0   :  { %9 = vsyncpa [#allocation3], 0  ;;  %s870_s0 = inlined_call_operand.hbm [shape: f32[2,32,49], index: 0, kind: input, shape index: {}]   ;;  %s871_s1 = inlined_call_operand.vmem [shape: f32[32,49], index: 1, kind: input, shape index: {}]   ;;  %s872_s2 = inlined_call_operand.vmem [shape: f32[2,32], index: 2, kind: input, shape index: {}]   ;;  %s873_s3 = inlined_call_operand.vmem [shape: f32[32,2], index: 3, kind: input, shape index: {}]   ;;  %s874_s4 = inlined_call_operand.hbm [shape: f32[2,32,49], index: 4, kind: output, shape index: {}]  }
   0x1   :  { %11 = vsyncpa [#allocation3 + $0x1], 0 }
   0x2   :  { %12 = vsyncpa [#allocation4], 0 }
   0x3   :  { %14 = vsyncpa [#allocation4 + $0x1], 0  ;;  %s653_s15 = smov 0   ;;  %s655_s16 = smov 0  }
   0x4   :  { %s657_s17 = smov 0   ;;  %s659_s18 = smov 0  }
   0x5 LB: > { %s674_s19 = sadd.s32 4294967295, %s620_s18   ;;  %s438_s20 = sadd.s32 4294967294, %s620_s18   ;;  %s620_s18 = sphi %s659_s18, %s887_s18   ;;  %s616_s17 = sphi %s657_s17, %s886_s17   ;;  %s612_s16 = sphi %s655_s16, %s885_s16   ;;  %s608_s15 = sphi %s653_s15, %s884_s15  }
   0x6   : > { %s678_s21 = sadd.s32 1, %s620_s18   ;;  %s27_s22 = sadd.s32 1, %s616_s17 }
   0x7   : > { %s24_s23 = ssub.s32 %s620_s18, %s678_s21  ;;  %p34_p0 = scmp.ne.s32.totalorder %s616_s17, %s612_s16 }
   0x8   : > { %p25_p1 = scmp.eq.s32.totalorder %s24_s23, 0  ;;  %p35_p2 = scmp.eq.s32.totalorder %s620_s18, 0 }
   0x9   : > { %p40_p3 = scmp.ne.s32.totalorder %s612_s16, %s608_s15  ;;  %p41_p4 = scmp.eq.s32.totalorder %s674_s19, 0 }
   0xa   : > { %s690_s24 = scalar_select %p25_p1, %s616_s17, %s27_s22  }
   0xb   : > { %p692_p5 = por %p35_p2, %p34_p0  ;;  %p696_p6 = por %p41_p4, %p40_p3 }
   0xc   : > { %p127_p7 = scmp.eq.s32.totalorder %s674_s19, 1  ;;  %p133_p8 = scmp.eq.s32.totalorder %s438_s20, 1 }
   0xd   : > { %p470_p10 = scmp.lt.s32.totalorder %s620_s18, 2  ;;  %s162_s29 = sand.u32 1, %s616_s17  }
   0xe   : > { %p703_p11 = por %p127_p7, %p34_p0  ;;  %p707_p12 = por %p133_p8, %p40_p3 }
   0xf   : > { %s456_s30 = sshll.u32 %s620_s18, 9  ;;  %s441_s5 = sshll.u32 %s162_s29, 5 }
  0x10   : > { %s878_s27 = scalar_select %p703_p11, 1, 0 }
  0x11   : > { %s879_s28 = scalar_select %p707_p12, 1, 0 }
  0x12   : > { %s716_s8 = scalar_lea.hbm %s870_s0, %s456_s30  ;;  %s166_s9 = scalar_lea.vmem [#allocation2], %s441_s5 }
  0x13   : > { %s173_s10 = sshll.u32 %s166_s9, 4  ;;  %p720_p13 = pnand %p470_p10, %p692_p5  ;;  %s724_s10 = int_to_ptr.vmem [resolvable:$true] %s173_s10 }
  0x14   : > { %s726_s12 = scalar_lea.sflag [#allocation3], %s162_s29  ;;  %s524_s13 = scalar_lea.hbm %s716_s8, 512 }
  0x15   : > { %p525_p0 = scmp.ne.s32.totalorder %s716_s8, %s524_s13  ;;  %p526_p1 = pneg %p720_p13 }
  0x16   : > { %s529_s22 = scalar_lea.hbm %s870_s0, 1024  ;;  %p530_p4 = scmp.lt.u32.totalorder %s716_s8, %s870_s0 }
  0x17   : > { %p527_p2 = pnand %p526_p1, %p525_p0  ;;  %p531_p5 = scmp.lt.u32.totalorder %s529_s22, %s524_s13 }
  0x18   : > { %p533_p8 = scmp.lt.u32.totalorder %s524_s13, %s716_s8 }
  0x19   : > { %p528_p3 = pneg %p527_p2  ;;  %p532_p7 = por %p531_p5, %p530_p4 }
  0x1b   : > { %p534_p10 = por %p533_p8, %p532_p7 }
  0x1d   : > { %p535_p9 = pnand %p534_p10, %p528_p3 }
  0x1f   : > { %538 = shalt.err (!%p535_p9)
}
  0x20   : > { %s539_s29 = scalar_lea.vmem %s724_s10, 512  ;;  %s622_s30 = smov [#allocation2]  }
  0x21   : > { %p540_p0 = scmp.ne.s32.totalorder %s724_s10, %s539_s29  ;;  %s544_s5 = sshll.u32 %s622_s30, 4  ;;  %s545_s5 = int_to_ptr.vmem [resolvable:$false] %s544_s5 }
  0x22   : > { %s546_s6 = scalar_lea.vmem %s545_s5, 1024  ;;  %p547_p11 = scmp.lt.s32.totalorder %s724_s10, %s545_s5 }
  0x23   : > { %p542_p2 = pnand %p540_p0, %p526_p1  ;;  %p548_p4 = scmp.lt.s32.totalorder %s546_s6, %s539_s29 }
  0x25   : > { %p543_p12 = pneg %p542_p2  ;;  %p549_p5 = por %p548_p4, %p547_p11 }
  0x27   : > { %p550_p7 = pnand %p549_p5, %p543_p12 }
  0x29   : > { %553 = shalt.err (!%p550_p7)
}
  0x2a   : > { %s623_s7 = smov 128   ;;  %s624_s9 = smov 8  }
  0x2b   : > { %465 = dma.hbm_to_vmem [thread:$0]  (!%p720_p13), %s716_s8, 512, %s724_s10, %s726_s12, %s623_s7, %s623_s7, %s624_s9  }
  0x2c   : > { %p444_p9 = scmp.ge.s32.totalorder %s620_s18, 1  ;;  %p181_p1 = scmp.lt.s32.totalorder %s620_s18, 3 }
  0x2e   : > { %p182_p3 = pnand %p444_p9, %p181_p1 }
  0x2f   : > { %s757_s13 = sand.u32 (!%p182_p3), 1, %s612_s16  }
  0x30   : > { %185 = sbr.rel (%p182_p3) target bundleno = 554 (0x22a), region = 36  ;;  %s445_s14 = sshll.u32 (!%p182_p3), %s757_s13, 5 }
  0x31   : > { %s188_s20 = scalar_lea.sflag (!%p182_p3), [#allocation3], %s757_s13  ;;  %s191_s22 = scalar_lea.vmem (!%p182_p3), [#allocation2], %s445_s14 }
  0x37   : > { %599 = dma.done.wait (%p696_p6), %s188_s20, 512  }
  0x38   : > { %601 = vsyncadd (%p696_p6), %s188_s20, 4294966784  ;;  %v767_v0 = vld [vmem:[%s191_s22] sm:$0xff]  ;;  %vm228_vm0 = vcmask 400384   ;;  %v772_v2 = vld [vmem:[%s191_s22 + $0x10] sm:$0xff]  ;;  %v246_v16 = vlaneseq  ;;  %vm257_vm1 = vcmask 130112   ;;  %vm264_vm2 = vcmask 195712  }
  0x39   : > { %v220_v1 = vld [vmem:[%s871_s1] sm:$0xff]  ;;  %v222_v4 = vld [vmem:[%s871_s1 + $0x10] sm:$0xff]  ;;  %v778_v5 = vld [vmem:[%s191_s22 + $0x8] sm:$0xff]  ;;  %vm271_vm3 = vcmask 261312   ;;  %vm275_vm4 = vcmask 254976   ;;  %vm306_vm5 = vcmask 15360  }
  0x3a   : > { %v224_v3 = vmul.f32 %v220_v1, %v767_v0  ;;  %v221_v6 = vld [vmem:[%s871_s1 + $0x8] sm:$0xff]  ;;  %v226_v7 = vmul.f32 %v222_v4, %v772_v2  ;;  %v785_v9 = vld [vmem:[%s191_s22 + $0x18] sm:$0xff]  ;;  %v247_v17 = vand.u32 127, %v246_v16  ;;  %v249_v18 = vshrl.u32 %v246_v16, 7  ;;  %v241_v35 = vld [vmem:[%s872_s2] sm:$0x3] }
  0x3b   : > { %v225_v8 = vmul.f32 %v221_v6, %v778_v5  ;;  %v223_v10 = vld [vmem:[%s871_s1 + $0x18] sm:$0xff]  ;;  %v281_v42 = vld [vmem:[%s873_s3 + $0x8] sm:$0xff]  ;;  %v280_v43 = vld [vmem:[%s873_s3] sm:$0xff]  ;;  %s457_s12 = sshll.u32 %s674_s19, 9  ;;  %s215_s23 = scalar_lea.vmem [#allocation5], %s445_s14 }
  0x3c   : > { %v229_v11 = vsel %vm228_vm0, %v224_v3, 0.0  ;;  %v227_v12 = vmul.f32 %v223_v10, %v785_v9  ;;  %v235_v13 = vsel %vm228_vm0, %v226_v7, 0.0  ;;  %v252_v19 = vadd.s32 4294967288, %v247_v17  ;;  %v283_v45 = vld [vmem:[%s873_s3 + $0x18] sm:$0xff]  ;;  %v282_v46 = vld [vmem:[%s873_s3 + $0x10] sm:$0xff]  ;;  %s365_s26 = sshll.u32 %s215_s23, 4  ;;  %s821_s30 = scalar_lea.hbm %s874_s4, %s457_s12  ;;  %s823_s26 = int_to_ptr.vmem [resolvable:$true] %s365_s26 }
  0x3d   : > { %230 = vadd.xlane.f32.xlu0 %v229_v11  ;;  %236 = vadd.xlane.f32.xlu1 %v235_v13  ;;  %v232_v14 = vsel %vm228_vm0, %v225_v8, 0.0  ;;  %v259_v20 = vadd.s32 4294967280, %v247_v17  ;;  %v266_v21 = vadd.s32 4294967272, %v247_v17  ;;  %v250_v23 = vsub.s32 %v247_v17, %v249_v18  ;;  %s352_s19 = scalar_lea.sflag [#allocation4], %s757_s13  ;;  %s554_s14 = scalar_lea.vmem %s823_s26, 512 }
  0x3e   : > { %v238_v15 = vsel %vm228_vm0, %v227_v12, 0.0  ;;  %v255_v25 = vsub.s32 %v252_v19, %v249_v18  ;;  %p555_p6 = scmp.ne.s32.totalorder %s823_s26, %s554_s14  ;;  %p881_p11 = scmp.ne.s32.totalorder %s878_s27, 0 }
  0x3f   : > { %v262_v26 = vsub.s32 %v259_v20, %v249_v18  ;;  %v269_v27 = vsub.s32 %v266_v21, %v249_v18  ;;  %s625_s5 = smov [#allocation5]  }
  0x40   : > { %p556_p12 = pnand %p555_p6, %p881_p11  ;;  %s558_s6 = sshll.u32 %s625_s5, 4  ;;  %s559_s6 = int_to_ptr.vmem [resolvable:$false] %s558_s6 }
  0x41   : > { %233 = vadd.xlane.f32.xlu0 %v232_v14  ;;  %239 = vadd.xlane.f32.xlu1 %v238_v15  ;;  %s560_s7 = scalar_lea.vmem %s559_s6, 1024  ;;  %p561_p8 = scmp.lt.s32.totalorder %s823_s26, %s559_s6 }
  0x42   : > { %p557_p13 = pneg %p556_p12  ;;  %p562_p10 = scmp.lt.s32.totalorder %s560_s7, %s554_s14 }
  0x44   : > { %p563_p0 = por %p562_p10, %p561_p8 }
  0x46   : > { %p564_p2 = pnand %p563_p0, %p557_p13 }
  0xca   : > { %v231_v22 = vpop.xlane.xlu0 %230  ;;  %v237_v24 = vpop.xlane.xlu1 %236 }
  0xcb   : > { %v251_v29 = vrot.slane %v231_v22, %v250_v23  ;;  %v263_v32 = vrot.slane %v237_v24, %v262_v26 }
  0xce   : > { %v234_v28 = vpop.xlane.xlu0 %233  ;;  %v240_v31 = vpop.xlane.xlu1 %239 }
  0xcf   : > { %v256_v30 = vrot.slane %v234_v28, %v255_v25  ;;  %v270_v33 = vrot.slane %v240_v31, %v269_v27 }
  0xd1   : > { %v258_v34 = vsel %vm257_vm1, %v256_v30, %v251_v29 }
  0xd2   : > { %v265_v36 = vsel %vm264_vm2, %v263_v32, %v258_v34 }
  0xd3   : > { %v272_v37 = vsel %vm271_vm3, %v270_v33, %v265_v36 }
  0xd4   : > { %v274_v38 = vmul.f32 %v272_v37, %v241_v35 }
  0xd6   : > { %v276_v39 = vsel %vm275_vm4, %v274_v38, 0.0 }
  0xd7   : > { %277 = vadd.xlane.f32.xlu0 %v276_v39 }
 0x164   : > { %v278_v40 = vpop.xlane.xlu0 %277 }
 0x165   : > { %v279_v41 = vmax.f32 %v278_v40, 0.0 }
 0x167   : > { %v288_v44 = vrot.slane %v279_v41, %v250_v23 }
 0x169   : > { %v303_v47 = vmul.f32 %v288_v44, %v281_v42  ;;  %v302_v48 = vmul.f32 %v288_v44, %v280_v43  ;;  %v305_v51 = vmul.f32 %v288_v44, %v283_v45  ;;  %v304_v52 = vmul.f32 %v288_v44, %v282_v46 }
 0x16b   : > { %v310_v49 = vsel %vm306_vm5, %v303_v47, 0.0  ;;  %v307_v50 = vsel %vm306_vm5, %v302_v48, 0.0  ;;  %v316_v53 = vsel %vm306_vm5, %v305_v51, 0.0  ;;  %v313_v54 = vsel %vm306_vm5, %v304_v52, 0.0 }
 0x16c   : > { %311 = vadd.xlane.f32.xlu0 %v310_v49  ;;  %308 = vadd.xlane.f32.xlu1 %v307_v50 }
 0x170   : > { %317 = vadd.xlane.f32.xlu0 %v316_v53  ;;  %314 = vadd.xlane.f32.xlu1 %v313_v54 }
 0x1f9   : > { %v312_v55 = vpop.xlane.xlu0 %311  ;;  %v309_v56 = vpop.xlane.xlu1 %308 }
 0x1fa   : > { %v448_v57 = vmul.f32 -1.442695, %v312_v55  ;;  %v447_v58 = vmul.f32 -1.442695, %v309_v56 }
 0x1fc   : > { %508 = vpow2.f32 %v448_v57 }
 0x1fd   : > { %510 = vpow2.f32 %v447_v58  ;;  %v318_v59 = vpop.xlane.xlu0 %317  ;;  %v315_v60 = vpop.xlane.xlu1 %314 }
 0x1fe   : > { %v450_v61 = vmul.f32 -1.442695, %v318_v59  ;;  %v449_v62 = vmul.f32 -1.442695, %v315_v60 }
 0x200   : > { %512 = vpow2.f32 %v450_v61 }
 0x201   : > { %514 = vpow2.f32 %v449_v62 }
 0x206   : > { %v509_v63 = vpop.eup %508 }
 0x207   : > { %v511_v1 = vpop.eup %510  ;;  %v332_v3 = vadd.f32 1.0, %v509_v63 }
 0x208   : > { %v331_v4 = vadd.f32 1.0, %v511_v1 }
 0x209   : > { %516 = vrcp.f32 %v332_v3 }
 0x20a   : > { %v513_v6 = vpop.eup %512  ;;  %518 = vrcp.f32 %v331_v4 }
 0x20b   : > { %v515_v7 = vpop.eup %514  ;;  %v334_v8 = vadd.f32 1.0, %v513_v6 }
 0x20c   : > { %v333_v10 = vadd.f32 1.0, %v515_v7 }
 0x20d   : > { %520 = vrcp.f32 %v334_v8 }
 0x20e   : > { %522 = vrcp.f32 %v333_v10 }
 0x213   : > { %v517_v11 = vpop.eup %516 }
 0x214   : > { %v519_v12 = vpop.eup %518  ;;  %v344_v13 = vmul.f32 %v517_v11, %v778_v5 }
 0x215   : > { %v343_v14 = vmul.f32 %v519_v12, %v767_v0 }
 0x216   : > { %348 = vst.msk [vmem:[%s215_s23 + $0x8] sm:$0xff] %vm228_vm0, %v344_v13 }
 0x217   : > { %v521_v15 = vpop.eup %520  ;;  %347 = vst.msk [vmem:[%s215_s23] sm:$0xff] %vm228_vm0, %v343_v14 }
 0x218   : > { %v523_v16 = vpop.eup %522  ;;  %v346_v17 = vmul.f32 %v521_v15, %v785_v9 }
 0x219   : > { %v345_v0 = vmul.f32 %v523_v16, %v772_v2 }
 0x21a   : > { %350 = vst.msk [vmem:[%s215_s23 + $0x18] sm:$0xff] %vm228_vm0, %v346_v17 }
 0x21b   : > { %349 = vst.msk [vmem:[%s215_s23 + $0x10] sm:$0xff] %vm228_vm0, %v345_v0 }
 0x21c   : > { %567 = shalt.err (!%p564_p2)
}
 0x21d   : > { %s568_s9 = scalar_lea.hbm %s821_s30, 512  ;;  %s572_s8 = scalar_lea.hbm %s874_s4, 1024 }
 0x21e   : > { %p569_p4 = scmp.ne.s32.totalorder %s821_s30, %s568_s9  ;;  %p573_p9 = scmp.lt.u32.totalorder %s821_s30, %s874_s4 }
 0x21f   : > { %p574_p1 = scmp.lt.u32.totalorder %s572_s8, %s568_s9  ;;  %p576_p6 = scmp.lt.u32.totalorder %s568_s9, %s821_s30 }
 0x220   : > { %p570_p5 = pnand %p569_p4, %p881_p11 }
 0x221   : > { %p575_p3 = por %p574_p1, %p573_p9 }
 0x222   : > { %p571_p7 = pneg %p570_p5 }
 0x223   : > { %p577_p12 = por %p576_p6, %p575_p3 }
 0x225   : > { %p578_p13 = pnand %p577_p12, %p571_p7 }
 0x227   : > { %581 = shalt.err (!%p578_p13)
}
 0x228   : > { %s626_s12 = smov 128   ;;  %s627_s23 = smov 8  }
 0x229   : > { %460 = dma.vmem_to_hbm [thread:$0]  (%p881_p11), %s823_s26, 512, %s821_s30, %s352_s19, %s626_s12, %s626_s12, %s627_s23  }
 0x22a PF: > { %s380_s25 = sand.u32 1, %s608_s15   ;;  %p882_p8 = scmp.ne.s32.totalorder %s879_s28, 0 }
 0x22b   : > { %p883_p10 = scmp.ge.s32.totalorder %s620_s18, 2  ;;  %s381_s29 = scalar_lea.sflag [#allocation4], %s380_s25 }
 0x22d   : > { %p467_p0 = pnand %p883_p10, %p882_p8 }
 0x22f   : > { %603 = dma.done.wait (!%p467_p0), %s381_s29, 512  }
 0x230   : > { %605 = vsyncadd (!%p467_p0), %s381_s29, 4294966784  ;;  %p17_p2 = scmp.ge.s32.totalorder %s678_s21, 4   ;;  %s884_s15 = smov %s612_s16 }
 0x231   : > { %s885_s16 = smov %s616_s17  ;;  %s886_s17 = smov %s690_s24 }
 0x232   : > { %s887_s18 = smov %s678_s21  ;;  %19 = sbr.rel (!%p17_p2) target bundleno = 5 (0x5), region = 81 }
 0x239   :  { %386 = vsyncpa [#allocation3], 1 }
 0x23a   :  { %388 = vsyncpa [#allocation3 + $0x1], 1 }
 0x23b   :  { %389 = vsyncpa [#allocation4], 1 }
 0x23c   :  { %391 = vsyncpa [#allocation4 + $0x1], 1 }

</bundles_post_ra>
